<compile_context>
chip_gen: v6e
topology: v6e:2x2x1
jax: 0.10.0
libtpu: 0.0.40
codegen_flags: <defaults>
</compile_context>

<pallas_src>
import jax
import jax.numpy as jnp
from jax import lax
from jax.experimental import pallas as pl
from jax.experimental.pallas import tpu as pltpu


def _round_up(n, m):
    return ((n + m - 1) // m) * m


# --------------------------------------------------------------------------
# Weight folding: conv1x1 followed by conv3x3 (bias-free) collapses into one
# (Cout, 9*Cin) matmul applied to the 9-tap im2col of the *input*, because a
# zero-padded spatial shift commutes with a 1x1 conv (conv1x1(0) == 0).
#   kv path : kv_dw(kv_1x1(x))[o] = sum_{t,i} dw[o,t] * Wkv[o,i] * shift_t(x)[i]
#   q  path : q_dw(q_1x1(y))[o]   = sum_{t,j} (W3[:,:,t] @ Wq)[o,j] * shift_t(y)[j]
# Tap order t = ky*3 + kx matches the in-kernel shift enumeration.
# --------------------------------------------------------------------------
def _fold_weights(params, c):
    hp = lax.Precision.HIGHEST
    w_kv = params["kv_w"].reshape(2 * c, c).astype(jnp.float32)       # (2C, C)
    w_dw = params["kv_dw_w"].reshape(2 * c, 9).astype(jnp.float32)    # (2C, 9)
    kv_fold = (w_dw[:, :, None] * w_kv[:, None, :]).reshape(2 * c, 9 * c)

    w_q = params["q_w"].reshape(c, c).astype(jnp.float32)             # (C, C)
    w_q3 = params["q_dw_w"].reshape(c, c, 9).astype(jnp.float32)      # (C, C, 9)
    q_fold = jnp.einsum("oit,ij->otj", w_q3, w_q,
                        precision=hp).reshape(c, 9 * c)

    w_proj = params["proj_w"].reshape(c, c).astype(jnp.float32)
    temp = params["temperature"].reshape(-1).astype(jnp.float32)
    return kv_fold, q_fold, w_proj, temp


# --------------------------------------------------------------------------
# Fully fused kernel: one grid step == one batch element.
# --------------------------------------------------------------------------
def _make_fused_kernel(img_w, num_heads):
    def kernel(x_ref, y_ref, wkv_ref, wq_ref, wproj_ref, t_ref,
               o_ref, colx_ref, coly_ref, hout_ref):
        c = x_ref.shape[1]
        hw = x_ref.shape[2]
        ch = c // num_heads
        mxu_dt = wkv_ref.dtype                      # bf16 or f32 MXU operands
        pad = _round_up(img_w + 1, 128)             # lane-aligned halo padding

        # Column masks for horizontal taps (based on the *output* column).
        wcol = lax.broadcasted_iota(jnp.int32, (1, hw), 1) % img_w
        left_ok = wcol != 0                         # dx == -1 taps
        right_ok = wcol != (img_w - 1)              # dx == +1 taps

        def build_im2col(slab_ref, col_ref):
            # slab: (C, HW), channels on sublanes, flattened spatial on lanes.
            slab = slab_ref[0].astype(jnp.float32)
            zeros = jnp.zeros((c, pad), jnp.float32)
            xp = jnp.concatenate([zeros, slab, zeros], axis=1)  # (C, HW+2*pad)
            for t in range(9):
                dy, dx = t // 3 - 1, t % 3 - 1
                s = dy * img_w + dx
                tap = xp[:, pad + s: pad + s + hw]              # static slice
                if dx == -1:
                    tap = jnp.where(left_ok, tap, jnp.zeros_like(tap))
                elif dx == 1:
                    tap = jnp.where(right_ok, tap, jnp.zeros_like(tap))
                col_ref[t * c:(t + 1) * c, :] = tap

        # Fused conv1x1 + 3x3 (depthwise / full): one K=9C matmul per branch.
        build_im2col(x_ref, colx_ref)
        build_im2col(y_ref, coly_ref)
        kv = jnp.dot(wkv_ref[...], colx_ref[...].astype(mxu_dt),
                     preferred_element_type=jnp.float32)        # (2C, HW) f32
        q = jnp.dot(wq_ref[...], coly_ref[...].astype(mxu_dt),
                    preferred_element_type=jnp.float32)         # (C, HW)  f32
        k = kv[:c, :]                                           # chunk(2, dim=1)
        v = kv[c:, :]

        # Channel ("transposed") attention: all heads in this grid step.
        for hd in range(num_heads):
            qh = q[hd * ch:(hd + 1) * ch, :]
            kh = k[hd * ch:(hd + 1) * ch, :]
            vh = v[hd * ch:(hd + 1) * ch, :]
            # F.normalize(dim=-1): x/max(||x||,1e-12) == x*rsqrt(max(||x||^2,1e-24))
            qn = qh * lax.rsqrt(jnp.maximum(
                jnp.sum(qh * qh, axis=-1, keepdims=True), 1e-24))
            kn = kh * lax.rsqrt(jnp.maximum(
                jnp.sum(kh * kh, axis=-1, keepdims=True), 1e-24))
            attn = lax.dot_general(qn, kn, (((1,), (1,)), ((), ())),
                                   preferred_element_type=jnp.float32)
            attn = attn * t_ref[hd]                 # per-head temperature (SMEM)
            attn = attn - jnp.max(attn, axis=-1, keepdims=True)
            e = jnp.exp(attn)
            p = e * pl.reciprocal(jnp.sum(e, axis=-1, keepdims=True))
            hout_ref[hd * ch:(hd + 1) * ch, :] = jnp.dot(
                p, vh, preferred_element_type=jnp.float32)

        # 1x1 output projection.
        o_ref[0] = jnp.dot(wproj_ref[...], hout_ref[...],
                           preferred_element_type=jnp.float32).astype(o_ref.dtype)

    return kernel


def attention_forward(x_nchw, y_nchw, params, num_heads,
                      compute_dtype=jnp.float32):
    """Forward pass of the `Attention` module (NCHW in, NCHW out)."""
    b, c, h, w = x_nchw.shape
    assert c % num_heads == 0
    hw = h * w

    kv_fold, q_fold, w_proj, temp = _fold_weights(params, c)
    # NCHW -> (B, C, H*W): metadata-only reshape, no HBM transpose.
    xd = x_nchw.reshape(b, c, hw).astype(compute_dtype)
    yd = y_nchw.reshape(b, c, hw).astype(compute_dtype)
    kv_fold = kv_fold.astype(compute_dtype)
    q_fold = q_fold.astype(compute_dtype)

    # TODO(synk): for production-scale H*W, split the fused conv stage into a
    # spatially tiled pallas_call so the (9C, HW) im2col fits VMEM (64 MiB on
    # v7x); at the shapes exercised here everything fits comfortably.
    out = pl.pallas_call(
        _make_fused_kernel(w, num_heads),
        out_shape=jax.ShapeDtypeStruct((b, c, hw), jnp.float32),
        grid=(b,),
        in_specs=[
            pl.BlockSpec((1, c, hw), lambda i: (i, 0, 0)),        # x slab
            pl.BlockSpec((1, c, hw), lambda i: (i, 0, 0)),        # y slab
            pl.BlockSpec((2 * c, 9 * c), lambda i: (0, 0)),       # folded kv w
            pl.BlockSpec((c, 9 * c), lambda i: (0, 0)),           # folded q w
            pl.BlockSpec((c, c), lambda i: (0, 0)),               # projection w
            pl.BlockSpec(memory_space=pltpu.MemorySpace.SMEM),    # temperature
        ],
        out_specs=pl.BlockSpec((1, c, hw), lambda i: (i, 0, 0)),
        scratch_shapes=[
            pltpu.VMEM((9 * c, hw), jnp.float32),                 # im2col(x)
            pltpu.VMEM((9 * c, hw), jnp.float32),                 # im2col(y)
            pltpu.VMEM((c, hw), jnp.float32),                     # attn output
        ],
        compiler_params=pltpu.CompilerParams(
            dimension_semantics=("parallel",)),
    )(xd, yd, kv_fold, q_fold, w_proj, temp)

    return out.reshape(b, c, h, w)


# --------------------------------------------------------------------------
# Pure-JAX reference (unfused, matches the PyTorch module op-for-op).
# --------------------------------------------------------------------------
def reference_forward(x, y, params, num_heads):
    b, c, h, w = x.shape
    ch = c // num_heads
    hp = lax.Precision.HIGHEST
    dn = ("NCHW", "OIHW", "NCHW")

    kv = lax.conv_general_dilated(x, params["kv_w"], (1, 1), "VALID",
                                  dimension_numbers=dn, precision=hp)
    kv = lax.conv_general_dilated(kv, params["kv_dw_w"], (1, 1),
                                  ((1, 1), (1, 1)), dimension_numbers=dn,
                                  feature_group_count=2 * c, precision=hp)
    k, v = kv[:, :c], kv[:, c:]

    q = lax.conv_general_dilated(y, params["q_w"], (1, 1), "VALID",
                                 dimension_numbers=dn, precision=hp)
    q = lax.conv_general_dilated(q, params["q_dw_w"], (1, 1),
                                 ((1, 1), (1, 1)), dimension_numbers=dn,
                                 precision=hp)

    def heads(t):
        return t.reshape(b, num_heads, ch, h * w)

    qh, kh, vh = heads(q), heads(k), heads(v)

    def l2norm(t):  # F.normalize(dim=-1)
        return t / jnp.maximum(
            jnp.sqrt(jnp.sum(t * t, axis=-1, keepdims=True)), 1e-12)

    qh, kh = l2norm(qh), l2norm(kh)
    attn = jnp.einsum("bncx,bndx->bncd", qh, kh, precision=hp)
    attn = attn * params["temperature"][None]
    attn = jax.nn.softmax(attn, axis=-1)
    out = jnp.einsum("bncd,bndx->bncx", attn, vh, precision=hp)
    out = out.reshape(b, c, h, w)
    out = lax.conv_general_dilated(out, params["proj_w"], (1, 1), "VALID",
                                   dimension_numbers=dn, precision=hp)
    return out


if __name__ == "__main__":
    dim, num_heads = 8, 2
    b, h, w = 2, 16, 16

    key = jax.random.PRNGKey(0)
    ks = jax.random.split(key, 8)
    x = jax.random.normal(ks[0], (b, dim, h, w), jnp.float32)
    y = jax.random.normal(ks[1], (b, dim, h, w), jnp.float32)

    # PyTorch-shaped weights (all convs bias=False, OIHW layout).
    params = {
        "kv_w":    0.2 * jax.random.normal(ks[2], (2 * dim, dim, 1, 1), jnp.float32),
        "kv_dw_w": 0.2 * jax.random.normal(ks[3], (2 * dim, 1, 3, 3), jnp.float32),
        "q_w":     0.2 * jax.random.normal(ks[4], (dim, dim, 1, 1), jnp.float32),
        "q_dw_w":  0.2 * jax.random.normal(ks[5], (dim, dim, 3, 3), jnp.float32),
        "proj_w":  0.2 * jax.random.normal(ks[6], (dim, dim, 1, 1), jnp.float32),
        "temperature": (1.0 + 0.5 * jnp.arange(num_heads, dtype=jnp.float32)
                        ).reshape(num_heads, 1, 1),
    }

    ref = reference_forward(x, y, params, num_heads)

    # f32 path.  Tolerance: 1e-2 — the kernel itself is exact in f32, but TPU
    # MXU contractions at default precision may run as bf16 passes (~3e-3
    # observed worst case for these shapes), so the bound stays above that.
    out = jax.block_until_ready(attention_forward(x, y, params, num_heads))
    assert out.shape == (b, dim, h, w)
    err = float(jnp.max(jnp.abs(out - ref)))
    assert err < 1e-2, f"f32 mismatch vs reference: {err}"

    # bf16 MXU-operand path (halves HBM traffic on v6e/v7x); elementwise math
    # stays f32, so only operand rounding (~2^-9) enters.
    out_bf16 = jax.block_until_ready(
        attention_forward(x, y, params, num_heads, compute_dtype=jnp.bfloat16))
    err_bf16 = float(jnp.max(jnp.abs(out_bf16 - ref)))
    assert err_bf16 < 2.5e-2, f"bf16 mismatch vs reference: {err_bf16}"

    print("KERNEL_OK")
</pallas_src>

<mosaic_0001>
module attributes {stable_mosaic.version = 11 : i64} {
  func.func @kernel(%arg0: i32, %arg1: memref<1x8x256xf32, #tpu.memory_space<vmem>>, %arg2: memref<1x8x256xf32, #tpu.memory_space<vmem>>, %arg3: memref<16x72xf32, #tpu.memory_space<vmem>>, %arg4: memref<8x72xf32, #tpu.memory_space<vmem>>, %arg5: memref<8x8xf32, #tpu.memory_space<vmem>>, %arg6: memref<2xf32, #tpu.memory_space<smem>>, %arg7: memref<1x8x256xf32, #tpu.memory_space<vmem>>, %arg8: memref<72x256xf32, #tpu.memory_space<vmem>>, %arg9: memref<72x256xf32, #tpu.memory_space<vmem>>, %arg10: memref<8x256xf32, #tpu.memory_space<vmem>>) attributes {dimension_semantics = [#tpu.dimension_semantics<parallel>], iteration_bounds = array<i64: 2>, scalar_prefetch = 0 : i64, scratch_operands = 3 : i64, tpu.core_type = #tpu.core_type<tc>, window_params = [{transform_indices = @transform_0, window_bounds = array<i64: 1, 8, 256>}, {transform_indices = @transform_1, window_bounds = array<i64: 1, 8, 256>}, {pipeline_mode = #tpu.pipeline_mode<synchronous>, transform_indices = @transform_2, window_bounds = array<i64: 16, 72>}, {pipeline_mode = #tpu.pipeline_mode<synchronous>, transform_indices = @transform_3, window_bounds = array<i64: 8, 72>}, {pipeline_mode = #tpu.pipeline_mode<synchronous>, transform_indices = @transform_4, window_bounds = array<i64: 8, 8>}, {transform_indices = @transform_5, window_bounds = array<i64: 2>}, {transform_indices = @transform_6, window_bounds = array<i64: 1, 8, 256>}]} {
    %0 = tpu.iota {dimensions = array<i32: 1>} : vector<1x256xi32>
    %c16_i32 = arith.constant 16 : i32
    %c0_i32 = arith.constant 0 : i32
    %1 = arith.cmpi eq, %c16_i32, %c0_i32 : i32
    %c1_i32 = arith.constant 1 : i32
    %2 = arith.select %1, %c1_i32, %c16_i32 : i32
    %3 = vector.broadcast %2 : i32 to vector<1x256xi32>
    %4 = arith.remsi %0, %3 : vector<1x256xi32>
    %c0_i32_0 = arith.constant 0 : i32
    %5 = vector.broadcast %c0_i32_0 : i32 to vector<1x256xi32>
    %6 = arith.cmpi ne, %4, %5 : vector<1x256xi32>
    %c0_i32_1 = arith.constant 0 : i32
    %7 = vector.broadcast %c0_i32_1 : i32 to vector<1x256xi32>
    %8 = arith.cmpi slt, %4, %7 : vector<1x256xi32>
    %c0_i32_2 = arith.constant 0 : i32
    %9 = arith.cmpi slt, %2, %c0_i32_2 : i32
    %10 = vector.broadcast %9 : i1 to vector<1x256xi1>
    %11 = vector.broadcast %10 : vector<1x256xi1> to vector<1x256xi1>
    %12 = arith.xori %8, %11 : vector<1x256xi1>
    %13 = arith.andi %12, %6 : vector<1x256xi1>
    %14 = vector.broadcast %2 : i32 to vector<1x256xi32>
    %15 = arith.addi %4, %14 : vector<1x256xi32>
    %16 = arith.select %13, %15, %4 : vector<1x256xi1>, vector<1x256xi32>
    %c0_i32_3 = arith.constant 0 : i32
    %17 = vector.broadcast %c0_i32_3 : i32 to vector<1x256xi32>
    %18 = arith.cmpi ne, %16, %17 : vector<1x256xi32>
    %c15_i32 = arith.constant 15 : i32
    %19 = vector.broadcast %c15_i32 : i32 to vector<1x256xi32>
    %20 = arith.cmpi ne, %16, %19 : vector<1x256xi32>
    %c0 = arith.constant 0 : index
    %c0_4 = arith.constant 0 : index
    %c0_5 = arith.constant 0 : index
    %21 = vector.load %arg1[%c0, %c0_4, %c0_5] : memref<1x8x256xf32, #tpu.memory_space<vmem>>, vector<1x8x256xf32>
    %22 = vector.shape_cast %21 : vector<1x8x256xf32> to vector<8x256xf32>
    %cst = arith.constant 0.000000e+00 : f32
    %23 = vector.broadcast %cst : f32 to vector<8x128xf32>
    %24 = tpu.concatenate %23, %22, %23 in 1 : vector<8x128xf32>, vector<8x256xf32>, vector<8x128xf32> -> vector<8x512xf32>
    %25 = vector.extract_strided_slice %24 {offsets = [0, 111], sizes = [8, 256], strides = [1, 1]} : vector<8x512xf32> to vector<8x256xf32>
    %cst_6 = arith.constant 0.000000e+00 : f32
    %26 = vector.broadcast %cst_6 : f32 to vector<8x256xf32>
    %27 = vector.shape_cast %18 : vector<1x256xi1> to vector<1x256xi1>
    %28 = vector.broadcast %27 : vector<1x256xi1> to vector<8x256xi1>
    %29 = arith.select %28, %25, %26 : vector<8x256xi1>, vector<8x256xf32>
    %c0_7 = arith.constant 0 : index
    %c0_8 = arith.constant 0 : index
    %30 = vector.load %arg8[%c0_7, %c0_8] : memref<72x256xf32, #tpu.memory_space<vmem>>, vector<8x256xf32>
    tpu.vector_store %arg8[%c0_7, %c0_8], %29 {strides = array<i32>} : memref<72x256xf32, #tpu.memory_space<vmem>>, vector<8x256xf32>,
    %31 = vector.extract_strided_slice %24 {offsets = [0, 112], sizes = [8, 256], strides = [1, 1]} : vector<8x512xf32> to vector<8x256xf32>
    %c8 = arith.constant 8 : index
    %c0_9 = arith.constant 0 : index
    %32 = vector.load %arg8[%c8, %c0_9] : memref<72x256xf32, #tpu.memory_space<vmem>>, vector<8x256xf32>
    tpu.vector_store %arg8[%c8, %c0_9], %31 {strides = array<i32>} : memref<72x256xf32, #tpu.memory_space<vmem>>, vector<8x256xf32>,
    %33 = vector.extract_strided_slice %24 {offsets = [0, 113], sizes = [8, 256], strides = [1, 1]} : vector<8x512xf32> to vector<8x256xf32>
    %cst_10 = arith.constant 0.000000e+00 : f32
    %34 = vector.broadcast %cst_10 : f32 to vector<8x256xf32>
    %35 = vector.shape_cast %20 : vector<1x256xi1> to vector<1x256xi1>
    %36 = vector.broadcast %35 : vector<1x256xi1> to vector<8x256xi1>
    %37 = arith.select %36, %33, %34 : vector<8x256xi1>, vector<8x256xf32>
    %c16 = arith.constant 16 : index
    %c0_11 = arith.constant 0 : index
    %38 = vector.load %arg8[%c16, %c0_11] : memref<72x256xf32, #tpu.memory_space<vmem>>, vector<8x256xf32>
    tpu.vector_store %arg8[%c16, %c0_11], %37 {strides = array<i32>} : memref<72x256xf32, #tpu.memory_space<vmem>>, vector<8x256xf32>,
    %39 = vector.extract_strided_slice %24 {offsets = [0, 127], sizes = [8, 256], strides = [1, 1]} : vector<8x512xf32> to vector<8x256xf32>
    %cst_12 = arith.constant 0.000000e+00 : f32
    %40 = vector.broadcast %cst_12 : f32 to vector<8x256xf32>
    %41 = vector.shape_cast %18 : vector<1x256xi1> to vector<1x256xi1>
    %42 = vector.broadcast %41 : vector<1x256xi1> to vector<8x256xi1>
    %43 = arith.select %42, %39, %40 : vector<8x256xi1>, vector<8x256xf32>
    %c24 = arith.constant 24 : index
    %c0_13 = arith.constant 0 : index
    %44 = vector.load %arg8[%c24, %c0_13] : memref<72x256xf32, #tpu.memory_space<vmem>>, vector<8x256xf32>
    tpu.vector_store %arg8[%c24, %c0_13], %43 {strides = array<i32>} : memref<72x256xf32, #tpu.memory_space<vmem>>, vector<8x256xf32>,
    %45 = vector.extract_strided_slice %24 {offsets = [0, 128], sizes = [8, 256], strides = [1, 1]} : vector<8x512xf32> to vector<8x256xf32>
    %c32 = arith.constant 32 : index
    %c0_14 = arith.constant 0 : index
    %46 = vector.load %arg8[%c32, %c0_14] : memref<72x256xf32, #tpu.memory_space<vmem>>, vector<8x256xf32>
    tpu.vector_store %arg8[%c32, %c0_14], %45 {strides = array<i32>} : memref<72x256xf32, #tpu.memory_space<vmem>>, vector<8x256xf32>,
    %47 = vector.extract_strided_slice %24 {offsets = [0, 129], sizes = [8, 256], strides = [1, 1]} : vector<8x512xf32> to vector<8x256xf32>
    %cst_15 = arith.constant 0.000000e+00 : f32
    %48 = vector.broadcast %cst_15 : f32 to vector<8x256xf32>
    %49 = vector.shape_cast %20 : vector<1x256xi1> to vector<1x256xi1>
    %50 = vector.broadcast %49 : vector<1x256xi1> to vector<8x256xi1>
    %51 = arith.select %50, %47, %48 : vector<8x256xi1>, vector<8x256xf32>
    %c40 = arith.constant 40 : index
    %c0_16 = arith.constant 0 : index
    %52 = vector.load %arg8[%c40, %c0_16] : memref<72x256xf32, #tpu.memory_space<vmem>>, vector<8x256xf32>
    tpu.vector_store %arg8[%c40, %c0_16], %51 {strides = array<i32>} : memref<72x256xf32, #tpu.memory_space<vmem>>, vector<8x256xf32>,
    %53 = vector.extract_strided_slice %24 {offsets = [0, 143], sizes = [8, 256], strides = [1, 1]} : vector<8x512xf32> to vector<8x256xf32>
    %cst_17 = arith.constant 0.000000e+00 : f32
    %54 = vector.broadcast %cst_17 : f32 to vector<8x256xf32>
    %55 = vector.shape_cast %18 : vector<1x256xi1> to vector<1x256xi1>
    %56 = vector.broadcast %55 : vector<1x256xi1> to vector<8x256xi1>
    %57 = arith.select %56, %53, %54 : vector<8x256xi1>, vector<8x256xf32>
    %c48 = arith.constant 48 : index
    %c0_18 = arith.constant 0 : index
    %58 = vector.load %arg8[%c48, %c0_18] : memref<72x256xf32, #tpu.memory_space<vmem>>, vector<8x256xf32>
    tpu.vector_store %arg8[%c48, %c0_18], %57 {strides = array<i32>} : memref<72x256xf32, #tpu.memory_space<vmem>>, vector<8x256xf32>,
    %59 = vector.extract_strided_slice %24 {offsets = [0, 144], sizes = [8, 256], strides = [1, 1]} : vector<8x512xf32> to vector<8x256xf32>
    %c56 = arith.constant 56 : index
    %c0_19 = arith.constant 0 : index
    %60 = vector.load %arg8[%c56, %c0_19] : memref<72x256xf32, #tpu.memory_space<vmem>>, vector<8x256xf32>
    tpu.vector_store %arg8[%c56, %c0_19], %59 {strides = array<i32>} : memref<72x256xf32, #tpu.memory_space<vmem>>, vector<8x256xf32>,
    %61 = vector.extract_strided_slice %24 {offsets = [0, 145], sizes = [8, 256], strides = [1, 1]} : vector<8x512xf32> to vector<8x256xf32>
    %cst_20 = arith.constant 0.000000e+00 : f32
    %62 = vector.broadcast %cst_20 : f32 to vector<8x256xf32>
    %63 = vector.shape_cast %20 : vector<1x256xi1> to vector<1x256xi1>
    %64 = vector.broadcast %63 : vector<1x256xi1> to vector<8x256xi1>
    %65 = arith.select %64, %61, %62 : vector<8x256xi1>, vector<8x256xf32>
    %c64 = arith.constant 64 : index
    %c0_21 = arith.constant 0 : index
    %66 = vector.load %arg8[%c64, %c0_21] : memref<72x256xf32, #tpu.memory_space<vmem>>, vector<8x256xf32>
    tpu.vector_store %arg8[%c64, %c0_21], %65 {strides = array<i32>} : memref<72x256xf32, #tpu.memory_space<vmem>>, vector<8x256xf32>,
    %c0_22 = arith.constant 0 : index
    %c0_23 = arith.constant 0 : index
    %c0_24 = arith.constant 0 : index
    %67 = vector.load %arg2[%c0_22, %c0_23, %c0_24] : memref<1x8x256xf32, #tpu.memory_space<vmem>>, vector<1x8x256xf32>
    %68 = vector.shape_cast %67 : vector<1x8x256xf32> to vector<8x256xf32>
    %cst_25 = arith.constant 0.000000e+00 : f32
    %69 = vector.broadcast %cst_25 : f32 to vector<8x128xf32>
    %70 = tpu.concatenate %69, %68, %69 in 1 : vector<8x128xf32>, vector<8x256xf32>, vector<8x128xf32> -> vector<8x512xf32>
    %71 = vector.extract_strided_slice %70 {offsets = [0, 111], sizes = [8, 256], strides = [1, 1]} : vector<8x512xf32> to vector<8x256xf32>
    %cst_26 = arith.constant 0.000000e+00 : f32
    %72 = vector.broadcast %cst_26 : f32 to vector<8x256xf32>
    %73 = vector.shape_cast %18 : vector<1x256xi1> to vector<1x256xi1>
    %74 = vector.broadcast %73 : vector<1x256xi1> to vector<8x256xi1>
    %75 = arith.select %74, %71, %72 : vector<8x256xi1>, vector<8x256xf32>
    %c0_27 = arith.constant 0 : index
    %c0_28 = arith.constant 0 : index
    %76 = vector.load %arg9[%c0_27, %c0_28] : memref<72x256xf32, #tpu.memory_space<vmem>>, vector<8x256xf32>
    tpu.vector_store %arg9[%c0_27, %c0_28], %75 {strides = array<i32>} : memref<72x256xf32, #tpu.memory_space<vmem>>, vector<8x256xf32>,
    %77 = vector.extract_strided_slice %70 {offsets = [0, 112], sizes = [8, 256], strides = [1, 1]} : vector<8x512xf32> to vector<8x256xf32>
    %c8_29 = arith.constant 8 : index
    %c0_30 = arith.constant 0 : index
    %78 = vector.load %arg9[%c8_29, %c0_30] : memref<72x256xf32, #tpu.memory_space<vmem>>, vector<8x256xf32>
    tpu.vector_store %arg9[%c8_29, %c0_30], %77 {strides = array<i32>} : memref<72x256xf32, #tpu.memory_space<vmem>>, vector<8x256xf32>,
    %79 = vector.extract_strided_slice %70 {offsets = [0, 113], sizes = [8, 256], strides = [1, 1]} : vector<8x512xf32> to vector<8x256xf32>
    %cst_31 = arith.constant 0.000000e+00 : f32
    %80 = vector.broadcast %cst_31 : f32 to vector<8x256xf32>
    %81 = vector.shape_cast %20 : vector<1x256xi1> to vector<1x256xi1>
    %82 = vector.broadcast %81 : vector<1x256xi1> to vector<8x256xi1>
    %83 = arith.select %82, %79, %80 : vector<8x256xi1>, vector<8x256xf32>
    %c16_32 = arith.constant 16 : index
    %c0_33 = arith.constant 0 : index
    %84 = vector.load %arg9[%c16_32, %c0_33] : memref<72x256xf32, #tpu.memory_space<vmem>>, vector<8x256xf32>
    tpu.vector_store %arg9[%c16_32, %c0_33], %83 {strides = array<i32>} : memref<72x256xf32, #tpu.memory_space<vmem>>, vector<8x256xf32>,
    %85 = vector.extract_strided_slice %70 {offsets = [0, 127], sizes = [8, 256], strides = [1, 1]} : vector<8x512xf32> to vector<8x256xf32>
    %cst_34 = arith.constant 0.000000e+00 : f32
    %86 = vector.broadcast %cst_34 : f32 to vector<8x256xf32>
    %87 = vector.shape_cast %18 : vector<1x256xi1> to vector<1x256xi1>
    %88 = vector.broadcast %87 : vector<1x256xi1> to vector<8x256xi1>
    %89 = arith.select %88, %85, %86 : vector<8x256xi1>, vector<8x256xf32>
    %c24_35 = arith.constant 24 : index
    %c0_36 = arith.constant 0 : index
    %90 = vector.load %arg9[%c24_35, %c0_36] : memref<72x256xf32, #tpu.memory_space<vmem>>, vector<8x256xf32>
    tpu.vector_store %arg9[%c24_35, %c0_36], %89 {strides = array<i32>} : memref<72x256xf32, #tpu.memory_space<vmem>>, vector<8x256xf32>,
    %91 = vector.extract_strided_slice %70 {offsets = [0, 128], sizes = [8, 256], strides = [1, 1]} : vector<8x512xf32> to vector<8x256xf32>
    %c32_37 = arith.constant 32 : index
    %c0_38 = arith.constant 0 : index
    %92 = vector.load %arg9[%c32_37, %c0_38] : memref<72x256xf32, #tpu.memory_space<vmem>>, vector<8x256xf32>
    tpu.vector_store %arg9[%c32_37, %c0_38], %91 {strides = array<i32>} : memref<72x256xf32, #tpu.memory_space<vmem>>, vector<8x256xf32>,
    %93 = vector.extract_strided_slice %70 {offsets = [0, 129], sizes = [8, 256], strides = [1, 1]} : vector<8x512xf32> to vector<8x256xf32>
    %cst_39 = arith.constant 0.000000e+00 : f32
    %94 = vector.broadcast %cst_39 : f32 to vector<8x256xf32>
    %95 = vector.shape_cast %20 : vector<1x256xi1> to vector<1x256xi1>
    %96 = vector.broadcast %95 : vector<1x256xi1> to vector<8x256xi1>
    %97 = arith.select %96, %93, %94 : vector<8x256xi1>, vector<8x256xf32>
    %c40_40 = arith.constant 40 : index
    %c0_41 = arith.constant 0 : index
    %98 = vector.load %arg9[%c40_40, %c0_41] : memref<72x256xf32, #tpu.memory_space<vmem>>, vector<8x256xf32>
    tpu.vector_store %arg9[%c40_40, %c0_41], %97 {strides = array<i32>} : memref<72x256xf32, #tpu.memory_space<vmem>>, vector<8x256xf32>,
    %99 = vector.extract_strided_slice %70 {offsets = [0, 143], sizes = [8, 256], strides = [1, 1]} : vector<8x512xf32> to vector<8x256xf32>
    %cst_42 = arith.constant 0.000000e+00 : f32
    %100 = vector.broadcast %cst_42 : f32 to vector<8x256xf32>
    %101 = vector.shape_cast %18 : vector<1x256xi1> to vector<1x256xi1>
    %102 = vector.broadcast %101 : vector<1x256xi1> to vector<8x256xi1>
    %103 = arith.select %102, %99, %100 : vector<8x256xi1>, vector<8x256xf32>
    %c48_43 = arith.constant 48 : index
    %c0_44 = arith.constant 0 : index
    %104 = vector.load %arg9[%c48_43, %c0_44] : memref<72x256xf32, #tpu.memory_space<vmem>>, vector<8x256xf32>
    tpu.vector_store %arg9[%c48_43, %c0_44], %103 {strides = array<i32>} : memref<72x256xf32, #tpu.memory_space<vmem>>, vector<8x256xf32>,
    %105 = vector.extract_strided_slice %70 {offsets = [0, 144], sizes = [8, 256], strides = [1, 1]} : vector<8x512xf32> to vector<8x256xf32>
    %c56_45 = arith.constant 56 : index
    %c0_46 = arith.constant 0 : index
    %106 = vector.load %arg9[%c56_45, %c0_46] : memref<72x256xf32, #tpu.memory_space<vmem>>, vector<8x256xf32>
    tpu.vector_store %arg9[%c56_45, %c0_46], %105 {strides = array<i32>} : memref<72x256xf32, #tpu.memory_space<vmem>>, vector<8x256xf32>,
    %107 = vector.extract_strided_slice %70 {offsets = [0, 145], sizes = [8, 256], strides = [1, 1]} : vector<8x512xf32> to vector<8x256xf32>
    %cst_47 = arith.constant 0.000000e+00 : f32
    %108 = vector.broadcast %cst_47 : f32 to vector<8x256xf32>
    %109 = vector.shape_cast %20 : vector<1x256xi1> to vector<1x256xi1>
    %110 = vector.broadcast %109 : vector<1x256xi1> to vector<8x256xi1>
    %111 = arith.select %110, %107, %108 : vector<8x256xi1>, vector<8x256xf32>
    %c64_48 = arith.constant 64 : index
    %c0_49 = arith.constant 0 : index
    %112 = vector.load %arg9[%c64_48, %c0_49] : memref<72x256xf32, #tpu.memory_space<vmem>>, vector<8x256xf32>
    tpu.vector_store %arg9[%c64_48, %c0_49], %111 {strides = array<i32>} : memref<72x256xf32, #tpu.memory_space<vmem>>, vector<8x256xf32>,
    %c0_50 = arith.constant 0 : index
    %c0_51 = arith.constant 0 : index
    %113 = vector.load %arg3[%c0_50, %c0_51] : memref<16x72xf32, #tpu.memory_space<vmem>>, vector<16x72xf32>
    %c0_52 = arith.constant 0 : index
    %c0_53 = arith.constant 0 : index
    %114 = vector.load %arg8[%c0_52, %c0_53] : memref<72x256xf32, #tpu.memory_space<vmem>>, vector<72x256xf32>
    %cst_54 = arith.constant dense<0.000000e+00> : vector<16x256xf32>
    %115 = tpu.matmul %113, %114, %cst_54 {dimension_numbers = #tpu.dot_dimension_numbers<[1], [0], [0], [1], [0, 0, 1, 1], [], []>} : vector<16x72xf32>, vector<72x256xf32>, vector<16x256xf32> -> vector<16x256xf32>
    %c0_55 = arith.constant 0 : index
    %c0_56 = arith.constant 0 : index
    %116 = vector.load %arg4[%c0_55, %c0_56] : memref<8x72xf32, #tpu.memory_space<vmem>>, vector<8x72xf32>
    %c0_57 = arith.constant 0 : index
    %c0_58 = arith.constant 0 : index
    %117 = vector.load %arg9[%c0_57, %c0_58] : memref<72x256xf32, #tpu.memory_space<vmem>>, vector<72x256xf32>
    %cst_59 = arith.constant dense<0.000000e+00> : vector<8x256xf32>
    %118 = tpu.matmul %116, %117, %cst_59 {dimension_numbers = #tpu.dot_dimension_numbers<[1], [0], [0], [1], [0, 0, 1, 1], [], []>} : vector<8x72xf32>, vector<72x256xf32>, vector<8x256xf32> -> vector<8x256xf32>
    %119 = vector.extract_strided_slice %115 {offsets = [0, 0], sizes = [8, 256], strides = [1, 1]} : vector<16x256xf32> to vector<8x256xf32>
    %120 = vector.extract_strided_slice %115 {offsets = [8, 0], sizes = [8, 256], strides = [1, 1]} : vector<16x256xf32> to vector<8x256xf32>
    %121 = vector.extract_strided_slice %118 {offsets = [0, 0], sizes = [4, 256], strides = [1, 1]} : vector<8x256xf32> to vector<4x256xf32>
    %122 = vector.extract_strided_slice %119 {offsets = [0, 0], sizes = [4, 256], strides = [1, 1]} : vector<8x256xf32> to vector<4x256xf32>
    %123 = vector.extract_strided_slice %120 {offsets = [0, 0], sizes = [4, 256], strides = [1, 1]} : vector<8x256xf32> to vector<4x256xf32>
    %124 = arith.mulf %121, %121 : vector<4x256xf32>
    %cst_60 = arith.constant dense<0.000000e+00> : vector<4xf32>
    %125 = vector.multi_reduction <add>, %124, %cst_60 [1] : vector<4x256xf32> to vector<4xf32>
    %126 = vector.shape_cast %125 : vector<4xf32> to vector<4x1xf32>
    %cst_61 = arith.constant 1.000000e-24 : f32
    %127 = vector.broadcast %cst_61 : f32 to vector<4x1xf32>
    %128 = arith.maximumf %126, %127 : vector<4x1xf32>
    %129 = math.rsqrt %128 : vector<4x1xf32>
    %130 = vector.broadcast %129 : vector<4x1xf32> to vector<4x256xf32>
    %131 = arith.mulf %121, %130 : vector<4x256xf32>
    %132 = arith.mulf %122, %122 : vector<4x256xf32>
    %cst_62 = arith.constant dense<0.000000e+00> : vector<4xf32>
    %133 = vector.multi_reduction <add>, %132, %cst_62 [1] : vector<4x256xf32> to vector<4xf32>
    %134 = vector.shape_cast %133 : vector<4xf32> to vector<4x1xf32>
    %cst_63 = arith.constant 1.000000e-24 : f32
    %135 = vector.broadcast %cst_63 : f32 to vector<4x1xf32>
    %136 = arith.maximumf %134, %135 : vector<4x1xf32>
    %137 = math.rsqrt %136 : vector<4x1xf32>
    %138 = vector.broadcast %137 : vector<4x1xf32> to vector<4x256xf32>
    %139 = arith.mulf %122, %138 : vector<4x256xf32>
    %cst_64 = arith.constant dense<0.000000e+00> : vector<4x4xf32>
    %140 = tpu.matmul %131, %139, %cst_64 {dimension_numbers = #tpu.dot_dimension_numbers<[1], [1], [0], [0], [0, 0, 1, 0], [], []>} : vector<4x256xf32>, vector<4x256xf32>, vector<4x4xf32> -> vector<4x4xf32>
    %c0_65 = arith.constant 0 : index
    %141 = memref.load %arg6[%c0_65] : memref<2xf32, #tpu.memory_space<smem>>
    %142 = vector.broadcast %141 : f32 to vector<4x4xf32>
    %143 = arith.mulf %140, %142 : vector<4x4xf32>
    %cst_66 = arith.constant dense<0xFF800000> : vector<4xf32>
    %144 = vector.multi_reduction <maximumf>, %143, %cst_66 [1] : vector<4x4xf32> to vector<4xf32>
    %145 = vector.shape_cast %144 : vector<4xf32> to vector<4x1xf32>
    %146 = vector.broadcast %145 : vector<4x1xf32> to vector<4x4xf32>
    %147 = arith.subf %143, %146 : vector<4x4xf32>
    %148 = math.exp %147 : vector<4x4xf32>
    %cst_67 = arith.constant dense<0.000000e+00> : vector<4xf32>
    %149 = vector.multi_reduction <add>, %148, %cst_67 [1] : vector<4x4xf32> to vector<4xf32>
    %150 = vector.shape_cast %149 : vector<4xf32> to vector<4x1xf32>
    %151 = tpu.reciprocal %150 : vector<4x1xf32> -> vector<4x1xf32>
    %152 = vector.broadcast %151 : vector<4x1xf32> to vector<4x4xf32>
    %153 = arith.mulf %148, %152 : vector<4x4xf32>
    %cst_68 = arith.constant dense<0.000000e+00> : vector<4x256xf32>
    %154 = tpu.matmul %153, %123, %cst_68 {dimension_numbers = #tpu.dot_dimension_numbers<[1], [0], [0], [1], [0, 0, 1, 1], [], []>} : vector<4x4xf32>, vector<4x256xf32>, vector<4x256xf32> -> vector<4x256xf32>
    %c0_69 = arith.constant 0 : index
    %c0_70 = arith.constant 0 : index
    %155 = vector.load %arg10[%c0_69, %c0_70] : memref<8x256xf32, #tpu.memory_space<vmem>>, vector<4x256xf32>
    tpu.vector_store %arg10[%c0_69, %c0_70], %154 {strides = array<i32>} : memref<8x256xf32, #tpu.memory_space<vmem>>, vector<4x256xf32>,
    %156 = vector.extract_strided_slice %118 {offsets = [4, 0], sizes = [4, 256], strides = [1, 1]} : vector<8x256xf32> to vector<4x256xf32>
    %157 = vector.extract_strided_slice %119 {offsets = [4, 0], sizes = [4, 256], strides = [1, 1]} : vector<8x256xf32> to vector<4x256xf32>
    %158 = vector.extract_strided_slice %120 {offsets = [4, 0], sizes = [4, 256], strides = [1, 1]} : vector<8x256xf32> to vector<4x256xf32>
    %159 = arith.mulf %156, %156 : vector<4x256xf32>
    %cst_71 = arith.constant dense<0.000000e+00> : vector<4xf32>
    %160 = vector.multi_reduction <add>, %159, %cst_71 [1] : vector<4x256xf32> to vector<4xf32>
    %161 = vector.shape_cast %160 : vector<4xf32> to vector<4x1xf32>
    %cst_72 = arith.constant 1.000000e-24 : f32
    %162 = vector.broadcast %cst_72 : f32 to vector<4x1xf32>
    %163 = arith.maximumf %161, %162 : vector<4x1xf32>
    %164 = math.rsqrt %163 : vector<4x1xf32>
    %165 = vector.broadcast %164 : vector<4x1xf32> to vector<4x256xf32>
    %166 = arith.mulf %156, %165 : vector<4x256xf32>
    %167 = arith.mulf %157, %157 : vector<4x256xf32>
    %cst_73 = arith.constant dense<0.000000e+00> : vector<4xf32>
    %168 = vector.multi_reduction <add>, %167, %cst_73 [1] : vector<4x256xf32> to vector<4xf32>
    %169 = vector.shape_cast %168 : vector<4xf32> to vector<4x1xf32>
    %cst_74 = arith.constant 1.000000e-24 : f32
    %170 = vector.broadcast %cst_74 : f32 to vector<4x1xf32>
    %171 = arith.maximumf %169, %170 : vector<4x1xf32>
    %172 = math.rsqrt %171 : vector<4x1xf32>
    %173 = vector.broadcast %172 : vector<4x1xf32> to vector<4x256xf32>
    %174 = arith.mulf %157, %173 : vector<4x256xf32>
    %cst_75 = arith.constant dense<0.000000e+00> : vector<4x4xf32>
    %175 = tpu.matmul %166, %174, %cst_75 {dimension_numbers = #tpu.dot_dimension_numbers<[1], [1], [0], [0], [0, 0, 1, 0], [], []>} : vector<4x256xf32>, vector<4x256xf32>, vector<4x4xf32> -> vector<4x4xf32>
    %c1 = arith.constant 1 : index
    %176 = memref.load %arg6[%c1] : memref<2xf32, #tpu.memory_space<smem>>
    %177 = vector.broadcast %176 : f32 to vector<4x4xf32>
    %178 = arith.mulf %175, %177 : vector<4x4xf32>
    %cst_76 = arith.constant dense<0xFF800000> : vector<4xf32>
    %179 = vector.multi_reduction <maximumf>, %178, %cst_76 [1] : vector<4x4xf32> to vector<4xf32>
    %180 = vector.shape_cast %179 : vector<4xf32> to vector<4x1xf32>
    %181 = vector.broadcast %180 : vector<4x1xf32> to vector<4x4xf32>
    %182 = arith.subf %178, %181 : vector<4x4xf32>
    %183 = math.exp %182 : vector<4x4xf32>
    %cst_77 = arith.constant dense<0.000000e+00> : vector<4xf32>
    %184 = vector.multi_reduction <add>, %183, %cst_77 [1] : vector<4x4xf32> to vector<4xf32>
    %185 = vector.shape_cast %184 : vector<4xf32> to vector<4x1xf32>
    %186 = tpu.reciprocal %185 : vector<4x1xf32> -> vector<4x1xf32>
    %187 = vector.broadcast %186 : vector<4x1xf32> to vector<4x4xf32>
    %188 = arith.mulf %183, %187 : vector<4x4xf32>
    %cst_78 = arith.constant dense<0.000000e+00> : vector<4x256xf32>
    %189 = tpu.matmul %188, %158, %cst_78 {dimension_numbers = #tpu.dot_dimension_numbers<[1], [0], [0], [1], [0, 0, 1, 1], [], []>} : vector<4x4xf32>, vector<4x256xf32>, vector<4x256xf32> -> vector<4x256xf32>
    %c4 = arith.constant 4 : index
    %c0_79 = arith.constant 0 : index
    %190 = vector.load %arg10[%c4, %c0_79] : memref<8x256xf32, #tpu.memory_space<vmem>>, vector<4x256xf32>
    tpu.vector_store %arg10[%c4, %c0_79], %189 {strides = array<i32>} : memref<8x256xf32, #tpu.memory_space<vmem>>, vector<4x256xf32>,
    %c0_80 = arith.constant 0 : index
    %c0_81 = arith.constant 0 : index
    %191 = vector.load %arg5[%c0_80, %c0_81] : memref<8x8xf32, #tpu.memory_space<vmem>>, vector<8x8xf32>
    %c0_82 = arith.constant 0 : index
    %c0_83 = arith.constant 0 : index
    %192 = vector.load %arg10[%c0_82, %c0_83] : memref<8x256xf32, #tpu.memory_space<vmem>>, vector<8x256xf32>
    %cst_84 = arith.constant dense<0.000000e+00> : vector<8x256xf32>
    %193 = tpu.matmul %191, %192, %cst_84 {dimension_numbers = #tpu.dot_dimension_numbers<[1], [0], [0], [1], [0, 0, 1, 1], [], []>} : vector<8x8xf32>, vector<8x256xf32>, vector<8x256xf32> -> vector<8x256xf32>
    %c0_85 = arith.constant 0 : index
    %c0_86 = arith.constant 0 : index
    %c0_87 = arith.constant 0 : index
    %194 = vector.load %arg7[%c0_85, %c0_86, %c0_87] : memref<1x8x256xf32, #tpu.memory_space<vmem>>, vector<1x8x256xf32>
    %195 = vector.shape_cast %194 : vector<1x8x256xf32> to vector<8x256xf32>
    %196 = vector.shape_cast %193 : vector<8x256xf32> to vector<1x8x256xf32>
    tpu.vector_store %arg7[%c0_85, %c0_86, %c0_87], %196 {strides = array<i32>} : memref<1x8x256xf32, #tpu.memory_space<vmem>>, vector<1x8x256xf32>,
    return
  }
  func.func @transform_0(%arg0: i32) -> (i32, i32, i32) {
    %c0_i32 = arith.constant 0 : i32
    %c0_i32_0 = arith.constant 0 : i32
    %c0_i32_1 = arith.constant 0 : i32
    return %arg0, %c0_i32, %c0_i32_0 : i32, i32, i32
  }
  func.func @transform_1(%arg0: i32) -> (i32, i32, i32) {
    %c0_i32 = arith.constant 0 : i32
    %c0_i32_0 = arith.constant 0 : i32
    %c0_i32_1 = arith.constant 0 : i32
    return %arg0, %c0_i32, %c0_i32_0 : i32, i32, i32
  }
  func.func @transform_2(%arg0: i32) -> (i32, i32) {
    %c0_i32 = arith.constant 0 : i32
    %c0_i32_0 = arith.constant 0 : i32
    %c0_i32_1 = arith.constant 0 : i32
    return %c0_i32, %c0_i32_0 : i32, i32
  }
  func.func @transform_3(%arg0: i32) -> (i32, i32) {
    %c0_i32 = arith.constant 0 : i32
    %c0_i32_0 = arith.constant 0 : i32
    %c0_i32_1 = arith.constant 0 : i32
    return %c0_i32, %c0_i32_0 : i32, i32
  }
  func.func @transform_4(%arg0: i32) -> (i32, i32) {
    %c0_i32 = arith.constant 0 : i32
    %c0_i32_0 = arith.constant 0 : i32
    %c0_i32_1 = arith.constant 0 : i32
    return %c0_i32, %c0_i32_0 : i32, i32
  }
  func.func @transform_5(%arg0: i32) -> i32 {
    %c0_i32 = arith.constant 0 : i32
    %c0_i32_0 = arith.constant 0 : i32
    return %c0_i32 : i32
  }
  func.func @transform_6(%arg0: i32) -> (i32, i32, i32) {
    %c0_i32 = arith.constant 0 : i32
    %c0_i32_0 = arith.constant 0 : i32
    %c0_i32_1 = arith.constant 0 : i32
    return %arg0, %c0_i32, %c0_i32_0 : i32, i32, i32
  }
}

</mosaic_0001>

<bundles_post_ra>
// kernel: tpu_custom_call.1
= control target key start
LH: loop header
LB: loop body
LE: loop exit
PB: predicated region body
PF: predicated region fallthrough
CT: control target
= control target key end

     0   :  { %s2340_s0 = inlined_call_operand.hbm [shape: f32[2,8,256], index: 0, kind: input, shape index: {}]   ;;  %s2341_s1 = inlined_call_operand.hbm [shape: f32[2,8,256], index: 1, kind: input, shape index: {}]   ;;  %s2342_s2 = inlined_call_operand.hbm [shape: f32[16,72], index: 2, kind: input, shape index: {}]   ;;  %s2343_s3 = inlined_call_operand.hbm [shape: f32[8,72], index: 3, kind: input, shape index: {}]   ;;  %s2344_s4 = inlined_call_operand.hbm [shape: f32[8,8], index: 4, kind: input, shape index: {}]   ;;  %s2345_s5 = inlined_call_operand.vmem [shape: f32[2], index: 5, kind: input, shape index: {}]   ;;  %s2346_s6 = inlined_call_operand.hbm [shape: f32[2,8,256], index: 6, kind: output, shape index: {}]  }
   0x1   :  { %2351 = sst [smem:[#allocation23_spill]] %s2342_s2 }
   0x2   :  { %2352 = sst [smem:[#allocation24_spill]] %s2343_s3 }
   0x3   :  { %2353 = sst [smem:[#allocation25_spill]] %s2344_s4 }
   0x4   :  { %11 = vsyncpa [#allocation6], 0 }
   0x5   :  { %13 = vsyncpa [#allocation6 + $0x1], 0 }
   0x6   :  { %14 = vsyncpa [#allocation10], 0 }
   0x7   :  { %16 = vsyncpa [#allocation10 + $0x1], 0 }
   0x8   :  { %17 = vsyncpa [#allocation13], 0 }
   0x9   :  { %18 = vsyncpa [#allocation8], 0 }
   0xa   :  { %19 = vsyncpa [#allocation7], 0 }
   0xb   :  { %21 = vsyncpa [#allocation7 + $0x1], 0  ;;  %s1905_s21 = smov 0   ;;  %s1907_s22 = smov 0  }
   0xc   :  { %s1909_s23 = smov 0   ;;  %s1911_s24 = smov 0  }
   0xd LB: > { %s1852_s25 = smov [#allocation11]   ;;  %s1926_s27 = sadd.s32 4294967295, %s1850_s24   ;;  %s1850_s24 = sphi %s1911_s24, %s2386_s24   ;;  %s1846_s23 = sphi %s1909_s23, %s2385_s23   ;;  %s1842_s22 = sphi %s1907_s22, %s2384_s22   ;;  %s1838_s21 = sphi %s1905_s21, %s2383_s21  }
   0xe   : > { %s206_s26 = sshll.u32 %s1852_s25, 4  ;;  %p1439_p0 = scmp.ge.s32.totalorder %s1850_s24, 1  ;;  %s207_s26 = int_to_ptr.vmem [resolvable:$true] %s206_s26 }
   0xf   : > { %p2347_p1 = scmp.eq.s32.totalorder %s1926_s27, 0  ;;  %p194_p2 = scmp.lt.s32.totalorder %s1850_s24, 3 }
  0x10   : > { %s1853_s29 = smov [#allocation12]   ;;  %s1854_s8 = smov [#allocation14]  }
  0x11   : > { %p1931_p3 = pnand %p1439_p0, %p194_p2  ;;  %s220_s30 = sshll.u32 %s1853_s29, 4  ;;  %s221_s30 = int_to_ptr.vmem [resolvable:$true] %s220_s30 }
  0x12   : > { %s231_s9 = sshll.u32 %s1854_s8, 4  ;;  %s242_s12 = sshll.u32 %s2345_s5, 4  ;;  %s1947_s9 = int_to_ptr.vmem [resolvable:$true] %s231_s9  ;;  %s243_s12 = int_to_ptr.vmem [resolvable:$true] %s242_s12 }
  0x13   : > { %s2354_s28 = scalar_select %p1931_p3, 1, 0 }
  0x14   : > { %p1524_p5 = pneg %p1931_p3  ;;  %s1632_s13 = scalar_lea.vmem %s207_s26, 256 }
  0x15   : > { %p1633_p8 = scmp.ne.s32.totalorder %s207_s26, %s1632_s13  ;;  %p1640_p11 = scmp.lt.s32.totalorder %s207_s26, %s207_s26 }
  0x16   : > { %p1940_p6 = pnand %p1524_p5, %p2347_p1  ;;  %p1641_p12 = scmp.lt.s32.totalorder %s1632_s13, %s1632_s13 }
  0x18   : > { %p1623_p7 = pneg %p1940_p6  ;;  %p1642_p13 = por %p1641_p12, %p1640_p11 }
  0x1a   : > { %p1635_p9 = pnand %p1633_p8, %p1623_p7 }
  0x1c   : > { %p1636_p10 = pneg %p1635_p9 }
  0x1e   : > { %p1643_p0 = pnand %p1642_p13, %p1636_p10 }
  0x20   : > { %1646 = shalt.err (!%p1643_p0)
}
  0x21   : > { %s1855_s14 = smov 128   ;;  %s1856_s15 = smov 8  }
  0x22   : > { %s2356_s2 = sld [smem:[#allocation23_spill]]  ;;  %s1658_s18 = scalar_lea.vmem %s221_s30, 128 }
  0x23   : > { %p1659_p2 = scmp.ne.s32.totalorder %s221_s30, %s1658_s18  ;;  %p1666_p9 = scmp.lt.s32.totalorder %s221_s30, %s221_s30 }
  0x24   : > { %p1667_p4 = scmp.lt.s32.totalorder %s1658_s18, %s1658_s18 }
  0x25   : > { %p1661_p5 = pnand %p1659_p2, %p1623_p7 }
  0x26   : > { %p1668_p11 = por %p1667_p4, %p1666_p9 }
  0x27   : > { %p1662_p8 = pneg %p1661_p5 }
  0x28   : > { %1527 = dma.hbm_to_vmem [thread:$0]  (!%p1940_p6), %s2356_s2, 256, %s207_s26, [#allocation10], %s1855_s14, %s1855_s14, %s1856_s15  }
  0x29   : > { %p1669_p10 = pnand %p1668_p11, %p1662_p8 }
  0x2b   : > { %1672 = shalt.err (!%p1669_p10)
}
  0x2c   : > { %s2357_s3 = sld [smem:[#allocation24_spill]]  ;;  %s1684_s25 = scalar_lea.vmem %s1947_s9, 128 }
  0x2d   : > { %p1685_p12 = scmp.ne.s32.totalorder %s1947_s9, %s1684_s25  ;;  %p1692_p4 = scmp.lt.s32.totalorder %s1947_s9, %s1947_s9 }
  0x2e   : > { %p1693_p2 = scmp.lt.s32.totalorder %s1684_s25, %s1684_s25 }
  0x2f   : > { %p1687_p13 = pnand %p1685_p12, %p1623_p7 }
  0x30   : > { %p1694_p5 = por %p1693_p2, %p1692_p4 }
  0x31   : > { %p1688_p0 = pneg %p1687_p13 }
  0x32   : > { %1530 = dma.hbm_to_vmem [thread:$0]  (!%p1940_p6), %s2357_s3, 128, %s221_s30, [#allocation13]  }
  0x33   : > { %p1695_p8 = pnand %p1694_p5, %p1688_p0 }
  0x35   : > { %1698 = shalt.err (!%p1695_p8)
}
  0x36   : > { %s2358_s4 = sld [smem:[#allocation25_spill]]  ;;  %s1699_s10 = scalar_lea.vmem %s243_s12, 16 }
  0x37   : > { %p1700_p9 = scmp.ne.s32.totalorder %s243_s12, %s1699_s10  ;;  %p1707_p12 = scmp.lt.s32.totalorder %s243_s12, %s243_s12 }
  0x38   : > { %p1708_p13 = scmp.lt.s32.totalorder %s1699_s10, %s1699_s10 }
  0x39   : > { %p1702_p11 = pnand %p1700_p9, %p1623_p7 }
  0x3a   : > { %p1709_p0 = por %p1708_p13, %p1707_p12 }
  0x3b   : > { %p1703_p10 = pneg %p1702_p11 }
  0x3c   : > { %1533 = dma.hbm_to_vmem [thread:$0]  (!%p1940_p6), %s2358_s4, 128, %s1947_s9, [#allocation13]  }
  0x3d   : > { %p1710_p4 = pnand %p1709_p0, %p1703_p10 }
  0x3f   : > { %1713 = shalt.err (!%p1710_p4)
}
  0x40   : > { %s1857_s11 = smov [#allocation15]   ;;  %s1438_s9 = sadd.s32 4294967294, %s1850_s24  }
  0x41   : > { %1536 = dma.vmem_to_smem (!%p1940_p6), %s243_s12, 16, %s1857_s11, [#allocation8]  }
  0x42   : > { %s1991_s13 = sadd.s32 1, %s1850_s24   ;;  %s34_s14 = sadd.s32 1, %s1846_s23 }
  0x43   : > { %s31_s7 = ssub.s32 %s1850_s24, %s1991_s13  ;;  %p41_p2 = scmp.ne.s32.totalorder %s1846_s23, %s1842_s22 }
  0x44   : > { %p32_p7 = scmp.eq.s32.totalorder %s31_s7, 0  ;;  %p42_p5 = scmp.eq.s32.totalorder %s1850_s24, 0 }
  0x45   : > { %p47_p8 = scmp.ne.s32.totalorder %s1842_s22, %s1838_s21  ;;  %p181_p11 = scmp.eq.s32.totalorder %s1926_s27, 1 }
  0x46   : > { %s2002_s15 = scalar_select %p32_p7, %s1846_s23, %s34_s14  }
  0x47   : > { %p2004_p9 = por %p42_p5, %p41_p2  ;;  %p2010_p6 = por %p2347_p1, %p47_p8 }
  0x48   : > { %p187_p10 = scmp.eq.s32.totalorder %s1438_s9, 1  ;;  %p1552_p12 = scmp.lt.s32.totalorder %s1850_s24, 2 }
  0x49   : > { %s2360_s12 = scalar_select %p2010_p6, 1, 0 }
  0x4a   : > { %s253_s17 = sand.u32 1, %s1846_s23   ;;  %p2017_p13 = por %p181_p11, %p41_p2 }
  0x4b   : > { %p2021_p0 = por %p187_p10, %p47_p8  ;;  %s2025_s20 = sshll.u32 %s253_s17, 4 }
  0x4c   : > { %s2361_s18 = scalar_select %p2017_p13, 1, 0 }
  0x4d   : > { %s2362_s19 = scalar_select %p2021_p0, 1, 0 }
  0x4e   : > { %s1475_s25 = sshll.u32 %s1850_s24, 8  ;;  %s257_s8 = scalar_lea.vmem [#allocation5], %s2025_s20 }
  0x4f   : > { %s2031_s30 = scalar_lea.hbm %s2340_s0, %s1475_s25  ;;  %s265_s10 = sshll.u32 %s257_s8, 4  ;;  %s2034_s10 = int_to_ptr.vmem [resolvable:$true] %s265_s10 }
  0x50   : > { %p2038_p4 = pnand %p1552_p12, %p2004_p9  ;;  %s2045_s14 = scalar_lea.hbm %s2341_s1, %s1475_s25 }
  0x51   : > { %s272_s26 = sand.u32 1, %s1850_s24   ;;  %s254_s29 = scalar_lea.sflag [#allocation6], %s253_s17 }
  0x52   : > { %s1714_s2 = scalar_lea.hbm %s2031_s30, 256  ;;  %p1716_p2 = pneg %p2038_p4 }
  0x53   : > { %p1715_p7 = scmp.ne.s32.totalorder %s2031_s30, %s1714_s2  ;;  %s1719_s3 = scalar_lea.hbm %s2340_s0, 512 }
  0x54   : > { %p1720_p9 = scmp.lt.s32.totalorder %s2031_s30, %s2340_s0  ;;  %p1721_p11 = scmp.lt.s32.totalorder %s1719_s3, %s1714_s2 }
  0x55   : > { %p1717_p5 = pnand %p1716_p2, %p1715_p7 }
  0x56   : > { %p1722_p10 = por %p1721_p11, %p1720_p9 }
  0x57   : > { %p1718_p8 = pneg %p1717_p5 }
  0x59   : > { %p1723_p12 = pnand %p1722_p10, %p1718_p8 }
  0x5b   : > { %1726 = shalt.err (!%p1723_p12)
}
  0x5c   : > { %s1727_s17 = scalar_lea.vmem %s2034_s10, 256  ;;  %s1858_s25 = smov [#allocation5]  }
  0x5d   : > { %p1728_p1 = scmp.ne.s32.totalorder %s2034_s10, %s1727_s17  ;;  %s1732_s7 = sshll.u32 %s1858_s25, 4  ;;  %s1733_s7 = int_to_ptr.vmem [resolvable:$false] %s1732_s7 }
  0x5e   : > { %s1734_s16 = scalar_lea.vmem %s1733_s7, 512  ;;  %p1735_p0 = scmp.lt.s32.totalorder %s2034_s10, %s1733_s7 }
  0x5f   : > { %p1730_p7 = pnand %p1728_p1, %p1716_p2  ;;  %p1736_p13 = scmp.lt.s32.totalorder %s1734_s16, %s1727_s17 }
  0x61   : > { %p1731_p5 = pneg %p1730_p7  ;;  %p1737_p6 = por %p1736_p13, %p1735_p0 }
  0x63   : > { %p1738_p9 = pnand %p1737_p6, %p1731_p5 }
  0x65   : > { %1741 = shalt.err (!%p1738_p9)
}
  0x66   : > { %1540 = dma.hbm_to_vmem [thread:$0]  (!%p2038_p4), %s2031_s30, 256, %s2034_s10, %s254_s29  }
  0x67   : > { %s276_s2 = scalar_lea.vmem [#allocation9], %s2025_s20  ;;  %s273_s4 = scalar_lea.sflag [#allocation10], %s272_s26 }
  0x68   : > { %s284_s3 = sshll.u32 %s276_s2, 4  ;;  %s1742_s8 = scalar_lea.hbm %s2045_s14, 256  ;;  %s285_s3 = int_to_ptr.vmem [resolvable:$true] %s284_s3 }
  0x69   : > { %p1743_p1 = scmp.ne.s32.totalorder %s2045_s14, %s1742_s8  ;;  %s1747_s25 = scalar_lea.hbm %s2341_s1, 512 }
  0x6a   : > { %p1748_p0 = scmp.lt.s32.totalorder %s2045_s14, %s2341_s1  ;;  %p1749_p8 = scmp.lt.s32.totalorder %s1747_s25, %s1742_s8 }
  0x6b   : > { %p1745_p6 = pnand %p1743_p1, %p1716_p2 }
  0x6c   : > { %p1750_p11 = por %p1749_p8, %p1748_p0 }
  0x6d   : > { %p1746_p13 = pneg %p1745_p6 }
  0x6f   : > { %p1751_p10 = pnand %p1750_p11, %p1746_p13 }
  0x71   : > { %1754 = shalt.err (!%p1751_p10)
}
  0x72   : > { %s1755_s20 = scalar_lea.vmem %s285_s3, 256  ;;  %s1859_s30 = smov [#allocation9]  }
  0x73   : > { %p1756_p12 = scmp.ne.s32.totalorder %s285_s3, %s1755_s20  ;;  %s1760_s10 = sshll.u32 %s1859_s30, 4  ;;  %s1761_s10 = int_to_ptr.vmem [resolvable:$false] %s1760_s10 }
  0x74   : > { %s1762_s26 = scalar_lea.vmem %s1761_s10, 512  ;;  %p1763_p9 = scmp.lt.s32.totalorder %s285_s3, %s1761_s10 }
  0x75   : > { %p1758_p7 = pnand %p1756_p12, %p1716_p2  ;;  %p1764_p1 = scmp.lt.s32.totalorder %s1762_s26, %s1755_s20 }
  0x77   : > { %p1759_p5 = pneg %p1758_p7  ;;  %p1765_p6 = por %p1764_p1, %p1763_p9 }
  0x79   : > { %p1766_p3 = pnand %p1765_p6, %p1759_p5 }
  0x7b   : > { %1769 = shalt.err (!%p1766_p3)
}
  0x7c   : > { %1543 = dma.hbm_to_vmem [thread:$0]  (!%p2038_p4), %s2045_s14, 256, %s285_s3, %s273_s4  }
  0x7d   : > { %p2364_p13 = scmp.ne.s32.totalorder %s2354_s28, 0 }
  0x7e   : > { %s2096_s29 = sand.u32 (!%p2364_p13), 1, %s1842_s22   ;;  %p2365_p2 = scmp.ne.s32.totalorder (!%p2364_p13), %s2360_s12, 0 }
  0x7f   : > { %293 = sbr.rel (%p2364_p13) target bundleno = 1628 (0x65c), region = 44  ;;  %s2099_s2 = sshll.u32 (!%p2364_p13), %s2096_s29, 4 }
  0x80   : > { %s296_s8 = scalar_lea.sflag (!%p2364_p13), [#allocation6], %s2096_s29  ;;  %s299_s9 = scalar_lea.vmem (!%p2364_p13), [#allocation5], %s2099_s2 }
  0x84   : > { %1813 = dma.done.wait (%p2365_p2), %s296_s8, 256  }
  0x85   : > { %1815 = vsyncadd (%p2365_p2), %s296_s8, 4294967040  ;;  %s304_s28 = sand.u32 1, %s1926_s27   ;;  %s308_s14 = scalar_lea.vmem [#allocation9], %s2099_s2 }
  0x86   : > { %s305_s11 = scalar_lea.sflag [#allocation10], %s304_s28 }
  0x87   : > { %1817 = dma.done.wait (%p2365_p2), %s305_s11, 256  }
  0x88   : > { %1819 = vsyncadd (%p2365_p2), %s305_s11, 4294967040  ;;  %p2366_p3 = scmp.eq.s32.totalorder %s1926_s27, 0 }
  0x8a   : > { %1821 = dma.done.wait (%p2366_p3), [#allocation10], 256   ;;  %p2367_p4 = pmov %p2366_p3 }
  0x8b   : > { %p2368_p0 = pmov %p2366_p3 }
  0x8c   : > { %1823 = vsyncadd (%p2367_p4), [#allocation10], 4294967040 }
  0x8d   : > { %1825 = dma.done.wait (%p2368_p0), [#allocation13], 256   ;;  %p2369_p8 = pmov %p2368_p0 }
  0x8e   : > { %p2370_p11 = pmov %p2368_p0 }
  0x8f   : > { %1827 = vsyncadd (%p2369_p8), [#allocation13], 4294967040 }
  0x90   : > { %1829 = dma.done.wait (%p2370_p11), [#allocation8], 16   ;;  %p2371_p10 = pmov %p2368_p0 }
  0x92   : > { %1831 = vsyncadd (%p2371_p10), [#allocation8], 4294967280 }
  0x93   : > { %329 = sfence }
  0x94   : > { %v2125_v0 = vld [vmem:[%s299_s9 + $0x8] sm:$0xff]  ;;  %v2127_v1 = vld [vmem:[%s299_s9] sm:$0xff]  ;;  %s1860_s12 = smov 111   ;;  %v1861_v2 = vmov 0.0   ;;  %s1862_s3 = smov 112   ;;  %v359_v5 = vlaneseq  ;;  %vm512_vm1 = vcmask 908288  }
  0x95   : > { %508 = vrot.lane.b32.xlu0 %v2125_v0, %s1860_s12  ;;  %506 = vrot.lane.b32.xlu1 %v2127_v1, %s1860_s12  ;;  %v2137_v3 = vld [vmem:[%s308_s14 + $0x8] sm:$0xff]  ;;  %s1863_s4 = smov 113   ;;  %v2141_v4 = vld [vmem:[%s308_s14] sm:$0xff]  ;;  %s1864_s17 = smov 127   ;;  %vm499_vm3 = vcmask 916480   ;;  %vm484_vm4 = vcmask 924672  }
  0x96   : > { %710 = vmatprep.mubr.f32.mxu0 %v1861_v2  ;;  %809 = vmatprep.mubr.f32.mxu1 %v1861_v2  ;;  %s1865_s25 = smov 1   ;;  %s1866_s7 = smov 15   ;;  %v360_v6 = vand.u32 127, %v359_v5  ;;  %vm469_vm7 = vcmask 1039360   ;;  %vm452_vm8 = vcmask 7168   ;;  %vm437_vm9 = vcmask 121856  }
  0x97   : > { %s1867_s16 = smov 16   ;;  %s1868_s20 = smov 17   ;;  %vm420_vm10 = vcmask 130048   ;;  %vm405_vm11 = vcmask 138240   ;;  %vm639_vm12 = vcmask 588800   ;;  %vm1007_vm13 = vcmask 1047556  }
  0x98   : > { %v361_v7 = vadd.s32 128, %v360_v6  ;;  %v366_v11 = vand.u32 15, %v360_v6  ;;  %vm818_vm14 = vcmask 1043456   ;;  %s909_s30 = sld [smem:[#allocation15]]  ;;  %vm912_vm15 = vcmask 27648   ;;  %s358_s26 = scalar_lea.vmem [#allocation16], %s2099_s2 }
  0x99   : > { %510 = vrot.lane.b32.xlu0 %v1861_v2, %s1860_s12  ;;  %495 = vrot.lane.b32.xlu1 %v2125_v0, %s1862_s3  ;;  %s1465_s10 = sld [smem:[#allocation15 + $0x1]]  ;;  %s1305_s8 = sshll.u32 %s358_s26, 4  ;;  %s2300_s8 = int_to_ptr.vmem [resolvable:$true] %s1305_s8 }
  0x9a   : > { %v373_v8 = vand.u32 15, %v361_v7  ;;  %vm2179_vm2 = vcmp.ne.s32.totalorder %v366_v11, 15  ;;  %vm2204_vm6 = vcmp.ne.s32.totalorder %v366_v11, 0  ;;  %s1477_s9 = sshll.u32 %s1926_s27, 8  ;;  %p2380_p7 = scmp.ne.s32.totalorder %s2361_s18, 0 }
  0x9b   : > { %s1303_s14 = scalar_lea.hbm %s2346_s6, %s1477_s9  ;;  %s1869_s27 = smov [#allocation16]  }
  0x9c   : > { %vm2175_vm0 = vcmp.ne.s32.totalorder %v373_v8, 15  ;;  %vm2194_vm5 = vcmp.ne.s32.totalorder %v373_v8, 0  ;;  %s1774_s2 = sshll.u32 %s1869_s27, 4  ;;  %s1775_s2 = int_to_ptr.vmem [resolvable:$false] %s1774_s2 }
  0x9d   : > { %497 = vrot.lane.b32.xlu0 %v1861_v2, %s1862_s3  ;;  %493 = vrot.lane.b32.xlu1 %v2127_v1, %s1862_s3  ;;  %p1777_p1 = scmp.lt.s32.totalorder %s2300_s8, %s1775_s2 }
  0xa1   : > { %609 = vrot.lane.b32.xlu0 %v2137_v3, %s1860_s12  ;;  %480 = vrot.lane.b32.xlu1 %v2125_v0, %s1863_s4 }
  0xa5   : > { %482 = vrot.lane.b32.xlu0 %v1861_v2, %s1863_s4  ;;  %607 = vrot.lane.b32.xlu1 %v2141_v4, %s1860_s12  ;;  %s1291_s12 = scalar_lea.sflag [#allocation7], %s2096_s29 }
  0xa9   : > { %478 = vrot.lane.b32.xlu0 %v2127_v1, %s1863_s4  ;;  %599 = vrot.lane.b32.xlu1 %v2137_v3, %s1862_s3 }
  0xad   : > { %465 = vrot.lane.b32.xlu0 %v2125_v0, %s1864_s17  ;;  %467 = vrot.lane.b32.xlu1 %v1861_v2, %s1864_s17 }
  0xb1   : > { %597 = vrot.lane.b32.xlu0 %v2141_v4, %s1862_s3  ;;  %463 = vrot.lane.b32.xlu1 %v2127_v1, %s1864_s17  ;;  %s1770_s3 = scalar_lea.vmem %s2300_s8, 256 }
  0xb2   : > { %p1771_p12 = scmp.ne.s32.totalorder %s2300_s8, %s1770_s3 }
  0xb4   : > { %p1772_p5 = pnand %p1771_p12, %p2380_p7 }
  0xb5   : > { %587 = vrot.lane.b32.xlu0 %v2137_v3, %s1863_s4  ;;  %585 = vrot.lane.b32.xlu1 %v2141_v4, %s1863_s4  ;;  %s1776_s4 = scalar_lea.vmem %s1775_s2, 512 }
  0xb6   : > { %p1773_p9 = pneg %p1772_p5  ;;  %p1778_p6 = scmp.lt.s32.totalorder %s1776_s4, %s1770_s3 }
  0xb8   : > { %p1779_p13 = por %p1778_p6, %p1777_p1 }
  0xb9   : > { %575 = vrot.lane.b32.xlu0 %v2137_v3, %s1864_s17  ;;  %448 = vrot.lane.b32.xlu1 %v2127_v1, %s1865_s25 }
  0xba   : > { %p1780_p2 = pnand %p1779_p13, %p1773_p9 }
  0xbd   : > { %450 = vrot.lane.b32.xlu0 %v2125_v0, %s1865_s25  ;;  %573 = vrot.lane.b32.xlu1 %v2141_v4, %s1864_s17 }
  0xc1   : > { %446 = vrot.lane.b32.xlu0 %v1861_v2, %s1865_s25  ;;  %433 = vrot.lane.b32.xlu1 %v2127_v1, %s1866_s7 }
  0xc5   : > { %435 = vrot.lane.b32.xlu0 %v2125_v0, %s1866_s7  ;;  %431 = vrot.lane.b32.xlu1 %v1861_v2, %s1866_s7 }
  0xc9   : > { %559 = vrot.lane.b32.xlu0 %v2141_v4, %s1865_s25  ;;  %561 = vrot.lane.b32.xlu1 %v2137_v3, %s1865_s25 }
  0xcd   : > { %416 = vrot.lane.b32.xlu0 %v2127_v1, %s1867_s16  ;;  %418 = vrot.lane.b32.xlu1 %v2125_v0, %s1867_s16 }
  0xd1   : > { %414 = vrot.lane.b32.xlu0 %v1861_v2, %s1867_s16  ;;  %547 = vrot.lane.b32.xlu1 %v2141_v4, %s1866_s7 }
  0xd5   : > { %549 = vrot.lane.b32.xlu0 %v2137_v3, %s1866_s7  ;;  %401 = vrot.lane.b32.xlu1 %v2127_v1, %s1868_s20 }
  0xd9   : > { %403 = vrot.lane.b32.xlu0 %v2125_v0, %s1868_s20  ;;  %399 = vrot.lane.b32.xlu1 %v1861_v2, %s1868_s20 }
  0xdd   : > { %537 = vrot.lane.b32.xlu0 %v2141_v4, %s1867_s16  ;;  %539 = vrot.lane.b32.xlu1 %v2137_v3, %s1867_s16 }
  0xe1   : > { %525 = vrot.lane.b32.xlu0 %v2141_v4, %s1868_s20  ;;  %527 = vrot.lane.b32.xlu1 %v2137_v3, %s1868_s20 }
 0x107   : > { %v509_v9 = vpop.permute.xlu0 %508  ;;  %v507_v10 = vpop.permute.xlu1 %506 }
 0x108   : > { %v513_v17 = vsel %vm512_vm1, %v507_v10, %v509_v9 }
 0x10b   : > { %v511_v13 = vpop.permute.xlu0 %510  ;;  %v496_v14 = vpop.permute.xlu1 %495 }
 0x10c   : > { %v514_v16 = vsel %vm512_vm1, %v509_v9, %v511_v13 }
 0x10d   : > { %1478 = vmatprep.subr.msk.mxu0 %vm2175_vm0, %v514_v16 }
 0x10e   : > { %1479 = vmatpush1.msk.msra.mxu0 %vm2179_vm2, %v513_v17  ;;  %v619_v17 = vld [vmem:[#allocation11] sm:$0xff] }
 0x10f   : > { %v498_v18 = vpop.permute.xlu0 %497  ;;  %v494_v19 = vpop.permute.xlu1 %493 }
 0x110   : > { %v501_v20 = vsel %vm499_vm3, %v496_v14, %v498_v18  ;;  %v500_v21 = vsel %vm499_vm3, %v494_v19, %v496_v14 }
 0x111   : > { %662 = vmatprep.subr.mxu0 %v501_v20 }
 0x112   : > { %663 = vmatpush1.msra.mxu0 %v500_v21 }
 0x113   : > { %v610_v22 = vpop.permute.xlu0 %609  ;;  %v481_v23 = vpop.permute.xlu1 %480 }
 0x114   : > { %v612_v24 = vsel %vm512_vm1, %v610_v22, %v511_v13 }
 0x115   : > { %1490 = vmatprep.subr.msk.mxu1 %vm2175_vm0, %v612_v24  ;;  %v723_v24 = vld [vmem:[#allocation12] sm:$0xff] }
 0x117   : > { %v483_v26 = vpop.permute.xlu0 %482  ;;  %v608_v27 = vpop.permute.xlu1 %607 }
 0x118   : > { %v486_v28 = vsel %vm484_vm4, %v481_v23, %v483_v26  ;;  %v611_v29 = vsel %vm512_vm1, %v608_v27, %v610_v22  ;;  %vm1213_vm1 = vcmask 64512  }
 0x119   : > { %1480 = vmatprep.subr.msk.mxu0 %vm2194_vm5, %v486_v28  ;;  %1491 = vmatpush1.msk.msra.mxu1 %vm2179_vm2, %v611_v29 }
 0x11b   : > { %v479_v31 = vpop.permute.xlu0 %478  ;;  %v600_v32 = vpop.permute.xlu1 %599 }
 0x11c   : > { %v485_v33 = vsel %vm484_vm4, %v479_v31, %v481_v23  ;;  %v602_v34 = vsel %vm499_vm3, %v600_v32, %v498_v18 }
 0x11d   : > { %1481 = vmatpush1.msk.msra.mxu0 %vm2204_vm6, %v485_v33  ;;  %761 = vmatprep.subr.mxu1 %v602_v34 }
 0x11f   : > { %v466_v35 = vpop.permute.xlu0 %465  ;;  %v468_v36 = vpop.permute.xlu1 %467 }
 0x120   : > { %v471_v37 = vsel %vm469_vm7, %v466_v35, %v468_v36 }
 0x121   : > { %1482 = vmatprep.subr.msk.mxu0 %vm2175_vm0, %v471_v37 }
 0x123   : > { %v598_v38 = vpop.permute.xlu0 %597  ;;  %v464_v39 = vpop.permute.xlu1 %463 }
 0x124   : > { %v470_v40 = vsel %vm469_vm7, %v464_v39, %v466_v35  ;;  %v601_v41 = vsel %vm499_vm3, %v598_v38, %v600_v32 }
 0x125   : > { %1483 = vmatpush1.msk.msra.mxu0 %vm2179_vm2, %v470_v40  ;;  %762 = vmatpush1.msra.mxu1 %v601_v41 }
 0x126   : > { %668 = vmatprep.subr.mxu0 %v2125_v0 }
 0x127   : > { %v588_v42 = vpop.permute.xlu0 %587  ;;  %v586_v43 = vpop.permute.xlu1 %585  ;;  %669 = vmatpush1.msra.mxu0 %v2127_v1 }
 0x128   : > { %v590_v44 = vsel %vm484_vm4, %v588_v42, %v483_v26  ;;  %v589_v45 = vsel %vm484_vm4, %v586_v43, %v588_v42 }
 0x129   : > { %1492 = vmatprep.subr.msk.mxu1 %vm2194_vm5, %v590_v44 }
 0x12a   : > { %1493 = vmatpush1.msk.msra.mxu1 %vm2204_vm6, %v589_v45 }
 0x12b   : > { %v576_v46 = vpop.permute.xlu0 %575  ;;  %v449_v47 = vpop.permute.xlu1 %448 }
 0x12c   : > { %v578_v48 = vsel %vm469_vm7, %v576_v46, %v468_v36 }
 0x12d   : > { %1494 = vmatprep.subr.msk.mxu1 %vm2175_vm0, %v578_v48 }
 0x12f   : > { %v451_v49 = vpop.permute.xlu0 %450  ;;  %v574_v50 = vpop.permute.xlu1 %573 }
 0x130   : > { %v454_v51 = vsel %vm452_vm8, %v449_v47, %v451_v49  ;;  %v577_v52 = vsel %vm469_vm7, %v574_v50, %v576_v46 }
 0x131   : > { %1484 = vmatprep.subr.msk.mxu0 %vm2194_vm5, %v454_v51  ;;  %1495 = vmatpush1.msk.msra.mxu1 %vm2179_vm2, %v577_v52 }
 0x132   : > { %767 = vmatprep.subr.mxu1 %v2137_v3 }
 0x133   : > { %v447_v53 = vpop.permute.xlu0 %446  ;;  %v434_v54 = vpop.permute.xlu1 %433  ;;  %768 = vmatpush1.msra.mxu1 %v2141_v4 }
 0x134   : > { %v453_v55 = vsel %vm452_vm8, %v447_v53, %v449_v47 }
 0x135   : > { %1485 = vmatpush1.msk.msra.mxu0 %vm2204_vm6, %v453_v55 }
 0x137   : > { %v436_v56 = vpop.permute.xlu0 %435  ;;  %v432_v57 = vpop.permute.xlu1 %431 }
 0x138   : > { %v439_v58 = vsel %vm437_vm9, %v434_v54, %v436_v56  ;;  %v438_v59 = vsel %vm437_vm9, %v432_v57, %v434_v54 }
 0x139   : > { %1486 = vmatprep.subr.msk.mxu0 %vm2175_vm0, %v439_v58 }
 0x13a   : > { %1487 = vmatpush1.msk.msra.mxu0 %vm2179_vm2, %v438_v59 }
 0x13b   : > { %v560_v60 = vpop.permute.xlu0 %559  ;;  %v562_v61 = vpop.permute.xlu1 %561 }
 0x13c   : > { %v563_v62 = vsel %vm452_vm8, %v447_v53, %v560_v60  ;;  %v564_v63 = vsel %vm452_vm8, %v560_v60, %v562_v61 }
 0x13d   : > { %1496 = vmatprep.subr.msk.mxu1 %vm2194_vm5, %v564_v63 }
 0x13e   : > { %1497 = vmatpush1.msk.msra.mxu1 %vm2204_vm6, %v563_v62 }
 0x13f   : > { %v417_v0 = vpop.permute.xlu0 %416  ;;  %v419_v1 = vpop.permute.xlu1 %418 }
 0x140   : > { %v422_v3 = vsel %vm420_vm10, %v417_v0, %v419_v1 }
 0x141   : > { %674 = vmatprep.subr.mxu0 %v422_v3 }
 0x143   : > { %v415_v4 = vpop.permute.xlu0 %414  ;;  %v548_v5 = vpop.permute.xlu1 %547 }
 0x144   : > { %v421_v6 = vsel %vm420_vm10, %v415_v4, %v417_v0  ;;  %v551_v10 = vsel %vm437_vm9, %v432_v57, %v548_v5 }
 0x145   : > { %675 = vmatpush1.msra.mxu0 %v421_v6  ;;  %v620_v6 = vld [vmem:[#allocation11 + $0x8] sm:$0xff] }
 0x147   : > { %v550_v7 = vpop.permute.xlu0 %549  ;;  %v402_v8 = vpop.permute.xlu1 %401 }
 0x148   : > { %v552_v9 = vsel %vm437_vm9, %v548_v5, %v550_v7  ;;  %v910_v7 = vstv %s909_s30 }
 0x149   : > { %1498 = vmatprep.subr.msk.mxu1 %vm2175_vm0, %v552_v9  ;;  %vm924_vm0 = vcmask 31744  }
 0x14a   : > { %1499 = vmatpush1.msk.msra.mxu1 %vm2179_vm2, %v551_v10 }
 0x14b   : > { %v404_v11 = vpop.permute.xlu0 %403  ;;  %v400_v13 = vpop.permute.xlu1 %399 }
 0x14c   : > { %v407_v14 = vsel %vm405_vm11, %v402_v8, %v404_v11  ;;  %v406_v16 = vsel %vm405_vm11, %v400_v13, %v402_v8 }
 0x14d   : > { %1488 = vmatprep.subr.msk.mxu0 %vm2194_vm5, %v407_v14 }
 0x14e   : > { %1489 = vmatpush1.msk.msra.mxu0 %vm2204_vm6, %v406_v16 }
 0x14f   : > { %v538_v12 = vpop.permute.xlu0 %537  ;;  %v540_v18 = vpop.permute.xlu1 %539  ;;  %1459 = vmatmul.mubr.msk.f32.vlgmr.msra.gmra.mxu0 %vm639_vm12, %v619_v17 }
 0x150   : > { %v542_v15 = vsel %vm420_vm10, %v538_v12, %v540_v18  ;;  %v541_v19 = vsel %vm420_vm10, %v415_v4, %v538_v12  ;;  %716 = vmatprep.mubr.f32.mxu0 %v1861_v2 }
 0x151   : > { %773 = vmatprep.subr.mxu1 %v542_v15 }
 0x152   : > { %774 = vmatpush1.msra.mxu1 %v541_v19 }
 0x153   : > { %v526_v20 = vpop.permute.xlu0 %525  ;;  %v528_v21 = vpop.permute.xlu1 %527  ;;  %1460 = vmatmul.mubr.msk.f32.gmra.mxu0 %vm639_vm12, %v620_v6 }
 0x154   : > { %v529_v22 = vsel %vm405_vm11, %v400_v13, %v526_v20  ;;  %v530_v23 = vsel %vm405_vm11, %v526_v20, %v528_v21  ;;  %998 = vmatprep.mubr.f32.mxu0 %v1861_v2  ;;  %v1109_v13 = vstv %s1465_s10 }
 0x155   : > { %1500 = vmatprep.subr.msk.mxu1 %vm2194_vm5, %v530_v23 }
 0x156   : > { %1501 = vmatpush1.msk.msra.mxu1 %vm2204_vm6, %v529_v22 }
 0x157   : > { %1461 = vmatmul.mubr.msk.f32.vlgmr.msra.gmra.mxu1 %vm639_vm12, %v723_v24 }
 0x20f   : > { %v712_v26 = vpop.f32.mrf.mxu0 }
 0x210   : > { %v828_v27 = vmul.f32 %v712_v26, %v712_v26 }
 0x211   : > { %v714_v28 = vpop.f32.mrf.mxu0 }
 0x212   : > { %v829_v29 = vmul.f32 %v714_v28, %v714_v28  ;;  %v1017_v31 = vsel %vm1007_vm13, %v828_v27, 0.0  ;;  %v830_v32 = vsel %vm818_vm14, %v828_v27, 0.0 }
 0x214   : > { %v1018_v33 = vsel %vm1007_vm13, %v829_v29, 0.0  ;;  %v831_v25 = vsel %vm818_vm14, %v829_v29, 0.0 }
 0x215   : > { %v1019_v34 = vadd.f32 %v1018_v33, %v1017_v31  ;;  %v832_v35 = vadd.f32 %v831_v25, %v830_v32 }
 0x217   : > { %v811_v30 = vpop.f32.mrf.mxu1  ;;  %1020 = vadd.xlane.f32.xlu1 %v1019_v34  ;;  %833 = vadd.xlane.f32.xlu0 %v832_v35 }
 0x218   : > { %v816_v36 = vmul.f32 %v811_v30, %v811_v30 }
 0x219   : > { %v813_v37 = vpop.f32.mrf.mxu1 }
 0x21a   : > { %v817_v38 = vmul.f32 %v813_v37, %v813_v37  ;;  %v819_v39 = vsel %vm818_vm14, %v816_v36, 0.0  ;;  %v1008_v43 = vsel %vm1007_vm13, %v816_v36, 0.0 }
 0x21c   : > { %v820_v40 = vsel %vm818_vm14, %v817_v38, 0.0  ;;  %v1009_v42 = vsel %vm1007_vm13, %v817_v38, 0.0 }
 0x21d   : > { %v821_v41 = vadd.f32 %v820_v40, %v819_v39  ;;  %v1010_v44 = vadd.f32 %v1009_v42, %v1008_v43 }
 0x21f   : > { %822 = vadd.xlane.f32.xlu0 %v821_v41 }
 0x223   : > { %1011 = vadd.xlane.f32.xlu0 %v1010_v44  ;;  %v1210_v44 = vld [vmem:[#allocation14] sm:$0xff] }
 0x2a0   : > { %v1021_v45 = vpop.xlane.xlu1 %1020  ;;  %v834_v46 = vpop.xlane.xlu0 %833 }
 0x2a1   : > { %v1022_v47 = vmax.f32 %v1021_v45, 1e-24  ;;  %v835_v48 = vmax.f32 %v834_v46, 1e-24 }
 0x2a3   : > { %1605 = vrsqrt.f32 %v1022_v47 }
 0x2a4   : > { %1607 = vrsqrt.f32 %v835_v48 }
 0x2a8   : > { %v823_v49 = vpop.xlane.xlu0 %822 }
 0x2a9   : > { %v824_v50 = vmax.f32 %v823_v49, 1e-24 }
 0x2ab   : > { %1609 = vrsqrt.f32 %v824_v50 }
 0x2ac   : > { %v1012_v51 = vpop.xlane.xlu0 %1011 }
 0x2ad   : > { %v1013_v52 = vmax.f32 %v1012_v51, 1e-24 }
 0x2af   : > { %1611 = vrsqrt.f32 %v1013_v52 }
 0x2b0   : > { %v1606_v53 = vpop.eup %1605 }
 0x2b1   : > { %v1608_v54 = vpop.eup %1607  ;;  %v1025_v55 = vmul.f32 %v1606_v53, %v714_v28  ;;  %v1024_v59 = vmul.f32 %v1606_v53, %v712_v26 }
 0x2b2   : > { %v838_v56 = vmul.f32 %v1608_v54, %v714_v28  ;;  %v837_v57 = vmul.f32 %v1608_v54, %v712_v26  ;;  %v718_v28 = vpop.f32.mrf.mxu0 }
 0x2b3   : > { %v1035_v58 = vrot.slane %v1025_v55, 4  ;;  %v1034_v63 = vrot.slane %v1024_v59, 4  ;;  %v1122_v34 = vrot.slane %v718_v28, 4 }
 0x2b4   : > { %869 = vmatprep.subr.mxu1 %v838_v56  ;;  %v720_v29 = vpop.f32.mrf.mxu0 }
 0x2b5   : > { %870 = vmatpush1.xpose.msra.mxu1 %v837_v57  ;;  %v1123_v31 = vrot.slane %v720_v29, 4  ;;  %1462 = vmatprep.subr.msk.mxu0 %vm818_vm14, %v720_v29 }
 0x2b6   : > { %1068 = vmatprep.subr.mxu1 %v1035_v58  ;;  %1463 = vmatpush1.msk.msra.mxu0 %vm818_vm14, %v718_v28 }
 0x2b7   : > { %1466 = vmatprep.subr.msk.mxu0 %vm818_vm14, %v1123_v31 }
 0x2b8   : > { %v1610_v60 = vpop.eup %1609 }
 0x2b9   : > { %v827_v61 = vmul.f32 %v1610_v60, %v813_v37  ;;  %v826_v62 = vmul.f32 %v1610_v60, %v811_v30 }
 0x2bb   : > { %903 = vmatprep.mubr.f32.mxu1 %v827_v61 }
 0x2bc   : > { %v1612_v0 = vpop.eup %1611  ;;  %904 = vmatmul.mubr.f32.vlgmr.msra.gmra.mxu1 %v826_v62 }
 0x2bd   : > { %1069 = vmatpush1.xpose.msra.mxu1 %v1034_v63  ;;  %v1016_v1 = vmul.f32 %v1612_v0, %v813_v37  ;;  %v1015_v3 = vmul.f32 %v1612_v0, %v811_v30 }
 0x2bf   : > { %v1029_v4 = vrot.slane %v1016_v1, 4  ;;  %v1028_v5 = vrot.slane %v1015_v3, 4 }
 0x2c1   : > { %1102 = vmatprep.mubr.f32.mxu1 %v1029_v4 }
 0x2c2   : > { %1103 = vmatmul.mubr.f32.vlgmr.msra.gmra.mxu1 %v1028_v5 }
 0x2c3   : > { %1281 = vmatprep.mubr.f32.mxu1 %v1861_v2 }
 0x37c   : > { %v905_v8 = vpop.f32.mrf.mxu1 }
 0x37d   : > { %v911_v9 = vmul.f32 %v910_v7, %v905_v8 }
 0x37e   : > { %v907_v10 = vpop.f32.mrf.mxu1 }
 0x37f   : > { %v913_v11 = vsel %vm912_vm15, %v911_v9, -inf }
 0x380   : > { %914 = vmax.xlane.f32.xlu1 %v913_v11 }
 0x382   : > { %v1104_v14 = vpop.f32.mrf.mxu1 }
 0x383   : > { %v1110_v16 = vmul.f32 %v1109_v13, %v1104_v14 }
 0x384   : > { %v1106_v17 = vpop.f32.mrf.mxu1 }
 0x385   : > { %v1111_v12 = vsel %vm912_vm15, %v1110_v16, -inf }
 0x386   : > { %1112 = vmax.xlane.f32.xlu0 %v1111_v12 }
 0x409   : > { %v915_v18 = vpop.xlane.xlu1 %914 }
 0x40a   : > { %v916_v15 = vsub.f32 %v911_v9, %v915_v18 }
 0x40c   : > { %v917_v19 = vmul.f32 1.442695, %v916_v15 }
 0x40e   : > { %1613 = vpow2.f32 %v917_v19 }
 0x40f   : > { %v1113_v20 = vpop.xlane.xlu0 %1112 }
 0x410   : > { %v1114_v21 = vsub.f32 %v1110_v16, %v1113_v20 }
 0x412   : > { %v1115_v22 = vmul.f32 1.442695, %v1114_v21 }
 0x414   : > { %1615 = vpow2.f32 %v1115_v22 }
 0x41b   : > { %v1614_v23 = vpop.eup %1613 }
 0x41c   : > { %v919_v24 = vsel %vm912_vm15, %v1614_v23, 0.0 }
 0x41d   : > { %920 = vadd.xlane.f32.xlu1 %v919_v24 }
 0x421   : > { %v1616_v26 = vpop.eup %1615 }
 0x422   : > { %v1117_v27 = vsel %vm912_vm15, %v1616_v26, 0.0 }
 0x423   : > { %1118 = vadd.xlane.f32.xlu0 %v1117_v27 }
 0x4a6   : > { %v921_v32 = vpop.xlane.xlu1 %920 }
 0x4a7   : > { %1617 = vrcp.f32 %v921_v32 }
 0x4ac   : > { %v1119_v33 = vpop.xlane.xlu0 %1118 }
 0x4ad   : > { %1619 = vrcp.f32 %v1119_v33 }
 0x4b4   : > { %v1618_v25 = vpop.eup %1617 }
 0x4b5   : > { %v923_v35 = vmul.f32 %v1618_v25, %v1614_v23 }
 0x4b7   : > { %1464 = vmatmul.mubr.msk.f32.vlgmr.msra.gmra.mxu0 %vm924_vm0, %v923_v35 }
 0x4b8   : > { %1467 = vmatpush1.msk.msra.mxu0 %vm818_vm14, %v1122_v34  ;;  %1195 = vmatprep.mubr.f32.mxu0 %v1861_v2 }
 0x4ba   : > { %v1620_v30 = vpop.eup %1619 }
 0x4bb   : > { %v1121_v36 = vmul.f32 %v1620_v30, %v1616_v26 }
 0x4bd   : > { %1468 = vmatmul.mubr.msk.f32.vlgmr.msra.gmra.mxu0 %vm924_vm0, %v1121_v36 }
 0x577   : > { %v1000_v37 = vpop.f32.mrf.mxu0 }
 0x578   : > { %1005 = vst [vmem:[#allocation4] sm:$0xf] %v1000_v37 }
 0x579   : > { %v1002_v38 = vpop.f32.mrf.mxu0 }
 0x57a   : > { %1006 = vst [vmem:[#allocation4 + $0x8] sm:$0xf] %v1002_v38 }
 0x57d   : > { %v1197_v39 = vpop.f32.mrf.mxu0 }
 0x57e   : > { %v1204_v40 = vrot.slane %v1197_v39, 4 }
 0x57f   : > { %v1199_v41 = vpop.f32.mrf.mxu0 }
 0x580   : > { %1208 = vst [vmem:[#allocation4] sm:$0xf0] %v1204_v40  ;;  %v1205_v42 = vrot.slane %v1199_v41, 4 }
 0x582   : > { %1209 = vst [vmem:[#allocation4 + $0x8] sm:$0xf0] %v1205_v42 }
 0x587   : > { %v1211_v2 = vld [vmem:[#allocation4] sm:$0xff] }
 0x589   : > { %v1212_v43 = vld [vmem:[#allocation4 + $0x8] sm:$0xff] }
 0x58a   : > { %1247 = vmatprep.subr.mxu1 %v1212_v43 }
 0x58b   : > { %1248 = vmatpush1.msra.mxu1 %v1211_v2 }
 0x58c   : > { %1469 = vmatmul.mubr.msk.f32.vlgmr.msra.gmra.mxu1 %vm1213_vm1, %v1210_v44 }
 0x64c   : > { %v1283_v45 = vpop.f32.mrf.mxu1 }
 0x64d   : > { %1288 = vst [vmem:[%s358_s26] sm:$0xff] %v1283_v45 }
 0x64e   : > { %v1285_v46 = vpop.f32.mrf.mxu1 }
 0x64f   : > { %1289 = vst [vmem:[%s358_s26 + $0x8] sm:$0xff] %v1285_v46 }
 0x650   : > { %1783 = shalt.err (!%p1780_p2)
}
 0x651   : > { %s1784_s17 = scalar_lea.hbm %s1303_s14, 256  ;;  %s1788_s7 = scalar_lea.hbm %s2346_s6, 512 }
 0x652   : > { %p1785_p3 = scmp.ne.s32.totalorder %s1303_s14, %s1784_s17  ;;  %p1789_p8 = scmp.lt.s32.totalorder %s1303_s14, %s2346_s6 }
 0x653   : > { %p1790_p11 = scmp.lt.s32.totalorder %s1788_s7, %s1784_s17 }
 0x654   : > { %p1786_p4 = pnand %p1785_p3, %p2380_p7 }
 0x655   : > { %p1791_p10 = por %p1790_p11, %p1789_p8 }
 0x656   : > { %p1787_p0 = pneg %p1786_p4 }
 0x658   : > { %p1792_p12 = pnand %p1791_p10, %p1787_p0 }
 0x65a   : > { %1795 = shalt.err (!%p1792_p12)
}
 0x65b   : > { %1522 = dma.vmem_to_hbm [thread:$0]  (%p2380_p7), %s2300_s8, 256, %s1303_s14, %s1291_s12  }
 0x65c PF: > { %s1317_s30 = sand.u32 1, %s1838_s21   ;;  %p2381_p5 = scmp.ne.s32.totalorder %s2362_s19, 0 }
 0x65d   : > { %p2382_p9 = scmp.ge.s32.totalorder %s1850_s24, 2  ;;  %s1318_s10 = scalar_lea.sflag [#allocation7], %s1317_s30 }
 0x65f   : > { %p1545_p1 = pnand %p2382_p9, %p2381_p5 }
 0x661   : > { %p1546_p6 = pneg %p1545_p1 }
 0x663   : > { %1833 = dma.done.wait (%p1546_p6), %s1318_s10, 256  }
 0x664   : > { %1835 = vsyncadd (%p1546_p6), %s1318_s10, 4294967040  ;;  %p24_p13 = scmp.ge.s32.totalorder %s1991_s13, 4   ;;  %s2383_s21 = smov %s1842_s22 }
 0x665   : > { %s2384_s22 = smov %s1846_s23  ;;  %s2385_s23 = smov %s2002_s15 }
 0x666   : > { %s2386_s24 = smov %s1991_s13  ;;  %26 = sbr.rel (!%p24_p13) target bundleno = 13 (0xd), region = 119 }
 0x66b   :  { %1323 = vsyncpa [#allocation6], 1 }
 0x66c   :  { %1325 = vsyncpa [#allocation6 + $0x1], 1 }
 0x66d   :  { %1326 = vsyncpa [#allocation10], 1 }
 0x66e   :  { %1328 = vsyncpa [#allocation10 + $0x1], 1 }
 0x66f   :  { %1329 = vsyncpa [#allocation13], 1 }
 0x670   :  { %1330 = vsyncpa [#allocation7], 1 }
 0x671   :  { %1332 = vsyncpa [#allocation7 + $0x1], 1 }
 0x672   :  { %1333 = vsyncpa [#allocation8], 1 }
 0x673   :  { %1335 = vsyncpa [#allocation8 + $0x1], 1 }

</bundles_post_ra>
